<compile_context>
chip_gen: v7x
topology: tpu7x:2x2x1
jax: 0.10.0
libtpu: 0.0.40
codegen_flags: <defaults>
</compile_context>

<pallas_src>
import jax
import jax.numpy as jnp
from jax.experimental import pallas as pl
from jax.experimental.pallas import tpu as pltpu


def _round_up(v, m):
    return (v + m - 1) // m * m


def _cdiv(a, b):
    return (a + b - 1) // b


def _vmem_limit_bytes():
    """Per-generation VMEM cap: ~48 MiB on v7x (64 MiB phys), ~96 MiB on v5e/v6e."""
    try:
        phys = int(pltpu.get_tpu_info().vmem_capacity_bytes)
    except Exception:
        phys = 64 * 1024 * 1024          # conservative (v7x-sized) fallback
    return max(32 * 1024 * 1024, min(phys * 3 // 4, 96 * 1024 * 1024))


def _make_kernel(ks, TH, Ws):
    """One grid step = one (row-block, Cout-tile): ks*ks shifted MXU dots, f32 acc."""
    MW = TH * Ws

    def kernel(x_ref, w_ref, b_ref, o_ref):
        # x_ref: (1, THB*Ws + ks-1, Cin4) bf16  — flattened haloed row block (s2d)
        # w_ref: (ks*ks, Cin4, TN)        bf16  — fused conv+avgpool weights per tap
        # b_ref: (1, TN)                  f32
        # o_ref: (1, TH*Ws, TN)           f32
        tn = o_ref.shape[-1]
        # bias folded into the accumulator init (feedback: no epilogue add)
        acc = jnp.broadcast_to(b_ref[...], (MW, tn)).astype(jnp.float32)
        for a in range(ks):                      # static unroll: ks*ks <= 4 taps for k=3
            for b in range(ks):
                off = a * Ws + b
                xs = x_ref[0, off:off + MW, :]   # contiguous (TH*Ws, Cin4) window
                acc = acc + jnp.dot(xs, w_ref[a * ks + b],
                                    preferred_element_type=jnp.float32)
        o_ref[0] = acc.astype(o_ref.dtype)

    return kernel


def conv_downscale2d(x, weight, bias, kernel_size):
    """x: (N,Cin,H,W) NCHW; weight: (Cout,Cin,k,k); bias: (Cout,).

    Returns (N, Cout, H//2, W//2) float32, matching
    downscale2d(conv2d(x, W, b, stride=1, padding=(k-1)//2), factor=2).
    """
    N, Cin, H, W = x.shape
    Cout = weight.shape[0]
    k = kernel_size
    assert k >= 1 and k % 2 == 1
    assert H % 2 == 0 and W % 2 == 0
    p = (k - 1) // 2
    Ho, Wo = H // 2, W // 2
    ks = (k + 1) // 2
    Cin4 = 4 * Cin

    # ---- weights: fuse the 2x2 avg-pool into the conv -> (k+1,k+1) kernel ----
    w_t = jnp.transpose(weight, (2, 3, 1, 0)).astype(jnp.float32)          # (k,k,Cin,Cout)
    w_p = jnp.pad(w_t, ((1, 1), (1, 1), (0, 0), (0, 0)))
    w_eff = 0.25 * (w_p[1:, 1:] + w_p[:-1, 1:] + w_p[1:, :-1] + w_p[:-1, :-1])
    # fold the stride-2 into channels (space-to-depth), keep taps as a leading axis
    w_s2d = (w_eff.reshape(ks, 2, ks, 2, Cin, Cout)
                  .transpose(0, 2, 1, 3, 4, 5)
                  .reshape(ks * ks, Cin4, Cout))

    Cout_pad = _round_up(Cout, 128)            # lane-dense output / dense MXU N dim
    TN = 256 if Cout_pad % 256 == 0 else 128   # 256-wide MXU on v6e/v7x when possible
    num_j = Cout_pad // TN
    w_mat = jnp.pad(w_s2d, ((0, 0), (0, 0), (0, Cout_pad - Cout))).astype(jnp.bfloat16)
    b_pad = jnp.pad(bias.astype(jnp.float32), (0, Cout_pad - Cout)).reshape(1, Cout_pad)

    # ---- activations: bf16 NHWC + "same" pad + space-to-depth (no im2col) ----
    x_bf = jnp.transpose(x, (0, 2, 3, 1)).astype(jnp.bfloat16)             # (N,H,W,Cin)
    x_bf = jnp.pad(x_bf, ((0, 0), (p, p), (p, p), (0, 0)))
    Hs, Ws = Ho + ks - 1, Wo + ks - 1
    x_s2d = (x_bf.reshape(N, Hs, 2, Ws, 2, Cin)
                 .transpose(0, 1, 3, 2, 4, 5)
                 .reshape(N, Hs, Ws, Cin4))

    # ---- row-tile selection under the per-generation VMEM budget ----
    vmem_limit = _vmem_limit_bytes()
    budget = int(vmem_limit * 0.8)

    def usage(th):
        thb = th + ks - 1
        l = thb * Ws + ks - 1
        return (2 * l * Cin4 * 2                      # x block (double-buffered)
                + 2 * ks * ks * Cin4 * TN * 2         # weight panel
                + 2 * th * Ws * TN * 4                # f32 output block
                + th * Ws * (TN * 8 + Cin4 * 2))      # in-kernel acc + one tap slice

    TH = Ho
    if N == 1 and Ho >= 2:
        TH = _cdiv(Ho, 2)     # >=2 row blocks so v7x's 2nd TensorCore gets work
    while TH > 8 and usage(TH) > budget:
        TH = _cdiv(TH, 2)     # shrink row block until the step fits VMEM
    n_h = _cdiv(Ho, TH)
    THB = TH + ks - 1
    NB = N * n_h
    L = THB * Ws + ks - 1     # flattened rows needed per block (incl. wrap slack)

    # haloed row blocks, flattened row-major per image; only (ks-1)/TH duplication
    # (when n_h == 1 this whole chain is a pure reshape — no gather, no copy).
    Hp = n_h * TH + ks - 1
    x_s2d = jnp.pad(x_s2d, ((0, 0), (0, Hp - Hs), (0, 0), (0, 0)))
    x_flat = jnp.pad(x_s2d.reshape(N, Hp * Ws, Cin4), ((0, 0), (0, ks - 1), (0, 0)))
    if n_h == 1:
        x_blocks = x_flat.reshape(N, 1, L, Cin4)
    else:
        x_blocks = jnp.stack(
            [x_flat[:, t * TH * Ws: t * TH * Ws + L] for t in range(n_h)], axis=1)
    x_blocks = x_blocks.reshape(NB, L, Cin4)

    # ---- grid ordering: keep the LARGER operand resident across the inner axis ----
    # (constant block index across consecutive steps => Pallas skips the re-DMA)
    x_total = NB * L * Cin4 * 2
    w_total = ks * ks * Cin4 * Cout_pad * 2
    if x_total >= w_total:
        # activations dominate HBM traffic: i outer -> x block fetched once,
        # the small weight panel is re-streamed per row block.
        grid = (NB, num_j)
        x_map = lambda i, j: (i, 0, 0)
        w_map = lambda i, j: (0, 0, j)
        b_map = lambda i, j: (0, j)
        o_map = lambda i, j: (i, 0, j)
    else:
        # deep small-spatial layers: weights dominate -> j outer keeps the weight
        # panel resident while the tiny activation blocks are re-streamed.
        grid = (num_j, NB)
        x_map = lambda j, i: (i, 0, 0)
        w_map = lambda j, i: (0, 0, j)
        b_map = lambda j, i: (0, j)
        o_map = lambda j, i: (i, 0, j)

    kernel = _make_kernel(ks, TH, Ws)

    out = pl.pallas_call(
        kernel,
        out_shape=jax.ShapeDtypeStruct((NB, TH * Ws, Cout_pad), jnp.float32),
        grid=grid,
        in_specs=[
            # NOTE: if profiling shows exposed DMA on the streaming operand, add
            # pipeline_mode=pl.Buffered(3) here (re-check the v7x VMEM budget).
            pl.BlockSpec((1, L, Cin4), x_map),
            pl.BlockSpec((ks * ks, Cin4, TN), w_map),
            pl.BlockSpec((1, TN), b_map),
        ],
        out_specs=pl.BlockSpec((1, TH * Ws, TN), o_map),
        compiler_params=pltpu.CompilerParams(
            dimension_semantics=("parallel", "parallel"),
            vmem_limit_bytes=vmem_limit,
        ),
    )(x_blocks, w_mat, b_pad)

    # drop padded rows, the Ws-Wo wrap columns and the padded Cout lanes
    out = out.reshape(N, n_h * TH, Ws, Cout_pad)[:, :Ho, :Wo, :Cout]
    # NCHW to match the PyTorch module's output layout.
    # TODO(synk): emit bf16 / keep NHWC if the downstream consumer allows it
    # (halves the writeback and removes this transpose pass).
    return jnp.transpose(out, (0, 3, 1, 2))


def _reference(x, weight, bias, kernel_size):
    """Plain-JAX f32 reference: conv2d(same, stride 1) + bias, then 2x2 avg pool."""
    N, Cin, H, W = x.shape
    Cout = weight.shape[0]
    p = (kernel_size - 1) // 2
    y = jax.lax.conv_general_dilated(
        x, weight, window_strides=(1, 1), padding=((p, p), (p, p)),
        dimension_numbers=("NCHW", "OIHW", "NCHW"))
    y = y + bias.reshape(1, -1, 1, 1)
    return y.reshape(N, Cout, H // 2, 2, W // 2, 2).mean(axis=(3, 5))


if __name__ == "__main__":
    N, Cin, Cout, H, W, k = 2, 4, 8, 16, 16, 3

    key = jax.random.PRNGKey(0)
    kx, kw, kb = jax.random.split(key, 3)
    x = jax.random.normal(kx, (N, Cin, H, W), jnp.float32)
    weight = jax.random.normal(kw, (Cout, Cin, k, k), jnp.float32) * 0.1
    bias = jax.random.normal(kb, (Cout,), jnp.float32) * 0.1

    conv_jit = jax.jit(conv_downscale2d, static_argnums=3)
    out = jax.block_until_ready(conv_jit(x, weight, bias, k))

    ref = _reference(x, weight, bias, k)
    assert out.shape == (N, Cout, H // 2, W // 2), out.shape
    # bf16 activations/weights with f32 accumulation -> loosened tolerance vs f32 ref.
    err = float(jnp.max(jnp.abs(out - ref)))
    assert err < 5e-2, err

    print("KERNEL_OK")
</pallas_src>

<mosaic_0001>
module attributes {stable_mosaic.version = 11 : i64} {
  func.func @kernel(%arg0: i32, %arg1: i32, %arg2: memref<1x82x16xbf16, #tpu.memory_space<vmem>>, %arg3: memref<4x16x128xbf16, #tpu.memory_space<vmem>>, %arg4: memref<1x128xf32, #tpu.memory_space<vmem>>, %arg5: memref<1x72x128xf32, #tpu.memory_space<vmem>>) attributes {dimension_semantics = [#tpu.dimension_semantics<parallel>, #tpu.dimension_semantics<parallel>], iteration_bounds = array<i64: 1, 2>, scalar_prefetch = 0 : i64, scratch_operands = 0 : i64, tpu.core_type = #tpu.core_type<tc>, window_params = [{transform_indices = @transform_0, window_bounds = array<i64: 1, 82, 16>}, {transform_indices = @transform_1, window_bounds = array<i64: 4, 16, 128>}, {transform_indices = @transform_2, window_bounds = array<i64: 1, 128>}, {transform_indices = @transform_3, window_bounds = array<i64: 1, 72, 128>}]} {
    %c0 = arith.constant 0 : index
    %c0_0 = arith.constant 0 : index
    %0 = vector.load %arg4[%c0, %c0_0] : memref<1x128xf32, #tpu.memory_space<vmem>>, vector<1x128xf32>
    %1 = vector.shape_cast %0 : vector<1x128xf32> to vector<1x128xf32>
    %2 = vector.broadcast %1 : vector<1x128xf32> to vector<72x128xf32>
    %c0_1 = arith.constant 0 : index
    %c0_2 = arith.constant 0 : index
    %c0_3 = arith.constant 0 : index
    %3 = vector.load %arg2[%c0_1, %c0_2, %c0_3] : memref<1x82x16xbf16, #tpu.memory_space<vmem>>, vector<1x72x16xbf16>
    %4 = vector.shape_cast %3 : vector<1x72x16xbf16> to vector<72x16xbf16>
    %c0_4 = arith.constant 0 : index
    %c0_5 = arith.constant 0 : index
    %c0_6 = arith.constant 0 : index
    %5 = vector.load %arg3[%c0_4, %c0_5, %c0_6] : memref<4x16x128xbf16, #tpu.memory_space<vmem>>, vector<1x16x128xbf16>
    %6 = vector.shape_cast %5 : vector<1x16x128xbf16> to vector<16x128xbf16>
    %cst = arith.constant dense<0.000000e+00> : vector<72x128xf32>
    %7 = tpu.matmul %4, %6, %cst {dimension_numbers = #tpu.dot_dimension_numbers<[1], [0], [0], [1], [0, 0, 1, 1], [], []>} : vector<72x16xbf16>, vector<16x128xbf16>, vector<72x128xf32> -> vector<72x128xf32>
    %8 = arith.addf %2, %7 : vector<72x128xf32>
    %c0_7 = arith.constant 0 : index
    %c1 = arith.constant 1 : index
    %c0_8 = arith.constant 0 : index
    %9 = vector.load %arg2[%c0_7, %c1, %c0_8] : memref<1x82x16xbf16, #tpu.memory_space<vmem>>, vector<1x72x16xbf16>
    %10 = vector.shape_cast %9 : vector<1x72x16xbf16> to vector<72x16xbf16>
    %c1_9 = arith.constant 1 : index
    %c0_10 = arith.constant 0 : index
    %c0_11 = arith.constant 0 : index
    %11 = vector.load %arg3[%c1_9, %c0_10, %c0_11] : memref<4x16x128xbf16, #tpu.memory_space<vmem>>, vector<1x16x128xbf16>
    %12 = vector.shape_cast %11 : vector<1x16x128xbf16> to vector<16x128xbf16>
    %cst_12 = arith.constant dense<0.000000e+00> : vector<72x128xf32>
    %13 = tpu.matmul %10, %12, %cst_12 {dimension_numbers = #tpu.dot_dimension_numbers<[1], [0], [0], [1], [0, 0, 1, 1], [], []>} : vector<72x16xbf16>, vector<16x128xbf16>, vector<72x128xf32> -> vector<72x128xf32>
    %14 = arith.addf %8, %13 : vector<72x128xf32>
    %c0_13 = arith.constant 0 : index
    %c9 = arith.constant 9 : index
    %c0_14 = arith.constant 0 : index
    %15 = vector.load %arg2[%c0_13, %c9, %c0_14] : memref<1x82x16xbf16, #tpu.memory_space<vmem>>, vector<1x72x16xbf16>
    %16 = vector.shape_cast %15 : vector<1x72x16xbf16> to vector<72x16xbf16>
    %c2 = arith.constant 2 : index
    %c0_15 = arith.constant 0 : index
    %c0_16 = arith.constant 0 : index
    %17 = vector.load %arg3[%c2, %c0_15, %c0_16] : memref<4x16x128xbf16, #tpu.memory_space<vmem>>, vector<1x16x128xbf16>
    %18 = vector.shape_cast %17 : vector<1x16x128xbf16> to vector<16x128xbf16>
    %cst_17 = arith.constant dense<0.000000e+00> : vector<72x128xf32>
    %19 = tpu.matmul %16, %18, %cst_17 {dimension_numbers = #tpu.dot_dimension_numbers<[1], [0], [0], [1], [0, 0, 1, 1], [], []>} : vector<72x16xbf16>, vector<16x128xbf16>, vector<72x128xf32> -> vector<72x128xf32>
    %20 = arith.addf %14, %19 : vector<72x128xf32>
    %c0_18 = arith.constant 0 : index
    %c10 = arith.constant 10 : index
    %c0_19 = arith.constant 0 : index
    %21 = vector.load %arg2[%c0_18, %c10, %c0_19] : memref<1x82x16xbf16, #tpu.memory_space<vmem>>, vector<1x72x16xbf16>
    %22 = vector.shape_cast %21 : vector<1x72x16xbf16> to vector<72x16xbf16>
    %c3 = arith.constant 3 : index
    %c0_20 = arith.constant 0 : index
    %c0_21 = arith.constant 0 : index
    %23 = vector.load %arg3[%c3, %c0_20, %c0_21] : memref<4x16x128xbf16, #tpu.memory_space<vmem>>, vector<1x16x128xbf16>
    %24 = vector.shape_cast %23 : vector<1x16x128xbf16> to vector<16x128xbf16>
    %cst_22 = arith.constant dense<0.000000e+00> : vector<72x128xf32>
    %25 = tpu.matmul %22, %24, %cst_22 {dimension_numbers = #tpu.dot_dimension_numbers<[1], [0], [0], [1], [0, 0, 1, 1], [], []>} : vector<72x16xbf16>, vector<16x128xbf16>, vector<72x128xf32> -> vector<72x128xf32>
    %26 = arith.addf %20, %25 : vector<72x128xf32>
    %c0_23 = arith.constant 0 : index
    %c0_24 = arith.constant 0 : index
    %c0_25 = arith.constant 0 : index
    %27 = vector.load %arg5[%c0_23, %c0_24, %c0_25] : memref<1x72x128xf32, #tpu.memory_space<vmem>>, vector<1x72x128xf32>
    %28 = vector.shape_cast %27 : vector<1x72x128xf32> to vector<72x128xf32>
    %29 = vector.shape_cast %26 : vector<72x128xf32> to vector<1x72x128xf32>
    tpu.vector_store %arg5[%c0_23, %c0_24, %c0_25], %29 {strides = array<i32>} : memref<1x72x128xf32, #tpu.memory_space<vmem>>, vector<1x72x128xf32>,
    return
  }
  func.func @transform_0(%arg0: i32, %arg1: i32) -> (i32, i32, i32) {
    %c0_i32 = arith.constant 0 : i32
    %c0_i32_0 = arith.constant 0 : i32
    %c0_i32_1 = arith.constant 0 : i32
    return %arg1, %c0_i32, %c0_i32_0 : i32, i32, i32
  }
  func.func @transform_1(%arg0: i32, %arg1: i32) -> (i32, i32, i32) {
    %c0_i32 = arith.constant 0 : i32
    %c0_i32_0 = arith.constant 0 : i32
    %c0_i32_1 = arith.constant 0 : i32
    return %c0_i32, %c0_i32_0, %arg0 : i32, i32, i32
  }
  func.func @transform_2(%arg0: i32, %arg1: i32) -> (i32, i32) {
    %c0_i32 = arith.constant 0 : i32
    %c0_i32_0 = arith.constant 0 : i32
    return %c0_i32, %arg0 : i32, i32
  }
  func.func @transform_3(%arg0: i32, %arg1: i32) -> (i32, i32, i32) {
    %c0_i32 = arith.constant 0 : i32
    %c0_i32_0 = arith.constant 0 : i32
    return %arg1, %c0_i32, %arg0 : i32, i32, i32
  }
}

</mosaic_0001>

<bundles_post_ra>
// kernel: conv_downscale2d.1
= control target key start
LH: loop header
LB: loop body
LE: loop exit
PB: predicated region body
PF: predicated region fallthrough
CT: control target
= control target key end

     0   :  { %s1281_s12 = smov 0   ;;  %s1283_s13 = smov 0   ;;  %s1463_s0 = inlined_call_operand.vmem [shape: bf16[2,82,16], index: 0, kind: input, shape index: {}]   ;;  %s1464_s1 = inlined_call_operand.vmem [shape: bf16[4,16,128], index: 1, kind: input, shape index: {}]   ;;  %s1465_s2 = inlined_call_operand.vmem [shape: f32[1,128], index: 2, kind: input, shape index: {}]   ;;  %s1466_s3 = inlined_call_operand.vmem [shape: f32[2,72,128], index: 3, kind: output, shape index: {}]  }
   0x1   :  { %s1285_s14 = smov 0  }
   0x2 LB: > { %s22_s15 = sadd.s32 1, %s1253_s13  ;;  %p965_p0 = scmp.ge.s32.totalorder %s1257_s14, 1  ;;  %s1257_s14 = sphi %s1285_s14, %s13_s14   ;;  %s1253_s13 = sphi %s1283_s13, %s1468_s13   ;;  %s1249_s12 = sphi %s1281_s12, %s1467_s12  }
   0x3   : > { %p23_p1 = scmp.ge.s32.totalorder %s22_s15, 2  ;;  %p168_p2 = scmp.lt.s32.totalorder %s1257_s14, 3 }
   0x5   : > { %s1470_s15 = smov (%p23_p1, %s22_s15), 0  ;;  %p169_p3 = pnand %p965_p0, %p168_p2 }
   0x6   : > { %v1215_v0 = vld [vmem:[%s1464_s1] sm:$0xff] (!%p169_p3)   ;;  %v1259_v1 = vmov (!%p169_p3), 0.0   ;;  %p202_p4 = scmp.lt.s32.totalorder (!%p169_p3), %s1249_s12, 1  ;;  %v1217_v2 = vld [vmem:[%s1464_s1 + $0x10] sm:$0xff] (!%p169_p3)   ;;  %vm1260_vm0 = vmmov (!%p169_p3), 0   ;;  %vm270_vm1 = vcmask (!%p169_p3), 130048  }
   0x7   : > { %172 = sbr.rel (%p169_p3) target bundleno = 316 (0x13c), region = 32  ;;  %1041 = vmatprep.subr.bf16.mxu1 (!%p169_p3), %v1259_v1  ;;  %1085 = vmatprep.subr.bf16.mxu0 (!%p169_p3), %v1259_v1  ;;  %v1218_v3 = vld [vmem:[%s1464_s1 + $0x8] sm:$0xff] (!%p169_p3)   ;;  %vm405_vm2 = vsmask.f32 (!%p169_p3), 7424  ;;  %v1221_v16 = vld [vmem:[%s1464_s1 + $0x18] sm:$0xff] (!%p169_p3)   ;;  %vm733_vm3 = vcmask (!%p169_p3), 1046528  }
   0x8   : > { %1042 = vmatpush3.bf16.msra.mxu1 (!%p169_p3), %v1215_v0  ;;  %1043 = vmatprep.mubr.msk.bf16.mxu1 (!%p169_p3), %vm1260_vm0, %v1259_v1 }
   0x9   : > { %1086 = vmatpush3.bf16.msra.mxu0 (!%p169_p3), %v1217_v2  ;;  %1063 = vmatprep.subr.bf16.mxu1 (!%p169_p3), %v1259_v1 }
   0xa   : > { %1087 = vmatprep.mubr.msk.bf16.mxu0 (!%p169_p3), %vm1260_vm0, %v1259_v1  ;;  %1107 = vmatprep.subr.bf16.mxu0 (!%p169_p3), %v1259_v1 }
   0xe   : > { %s1472_s12 = smov (!%p202_p4, %s1249_s12), 1 }
   0xf   : > { %s1187_s20 = smul.u32 44, %s1472_s12 }
  0x10   : > { %s1188_s30 = smul.u32 72, %s1472_s12 }
  0x11   : > { %s1319_s23 = scalar_lea.vmem %s1463_s0, %s1187_s20 }
  0x12   : > { %v1216_v4 = vld [vmem:[%s1319_s23] sm:$0xff]   ;;  %v1327_v6 = vld [vmem:[%s1319_s23 + $0x8] sm:$0xf]  ;;  %v1332_v8 = vld [vmem:[%s1319_s23 + $0xc] sm:$0xff]   ;;  %s1443_s6 = scalar_lea.vmem %s1466_s3, %s1188_s30 }
  0x13   : > { %v547_v5 = vld [vmem:[%s1319_s23 + $0x4] sm:$0xf]  ;;  %1044 = vmatmul.mubr.msk.bf16.vlgmr.msra.gmra.mrb[0].mxu1 %vm270_vm1, %v1216_v4  ;;  %v593_v11 = vshll.u32 %v1332_v8, 16  ;;  %v1338_v12 = vld [vmem:[%s1319_s23 + $0x14] sm:$0xff]   ;;  %v1222_v15 = vld [vmem:[%s1319_s23 + $0x8] sm:$0xff]   ;;  %v597_v18 = vshrl.u32 %v1332_v8, 16 }
  0x14   : > { %v995_v7 = vcombine.low %v547_v5, %v1327_v6  ;;  %1064 = vmatpush3.bf16.msra.mxu1 %v1218_v3  ;;  %1047 = vmatprep.mubr.msk.bf16.mxu1 %vm1260_vm0, %v1259_v1  ;;  %v601_v19 = vshll.u32 %v1338_v12, 16  ;;  %v1354_v23 = vld [vmem:[%s1319_s23 + $0x1c] sm:$0xff]   ;;  %v1224_v24 = vld [vmem:[%s1319_s23 + $0x10] sm:$0xff]   ;;  %v605_v26 = vshrl.u32 %v1338_v12, 16  ;;  %v1367_v30 = vld [vmem:[%s1319_s23 + $0x24] sm:$0x1f]  }
  0x15   : > { %v595_v14 = vrot.slane %v593_v11, 1  ;;  %v609_v27 = vshll.u32 %v1354_v23, 16  ;;  %v1226_v31 = vld [vmem:[%s1319_s23 + $0x18] sm:$0xff]   ;;  %v1229_v32 = vld [vmem:[%s1319_s23] sm:$0xff]   ;;  %v613_v34 = vshrl.u32 %v1354_v23, 16  ;;  %v617_v35 = vshll.u32 %v1367_v30, 16 }
  0x16   : > { %v586_v9 = vshrl.u32 %v995_v7, 16  ;;  %v588_v10 = vshll.u32 %v995_v7, 16  ;;  %v603_v22 = vrot.slane %v601_v19, 1  ;;  %v1230_v36 = vld [vmem:[%s1319_s23 + $0x8] sm:$0xff]   ;;  %v409_v37 = vshll.u32 %v1229_v32, 16  ;;  %v1232_v48 = vld [vmem:[%s1319_s23 + $0x10] sm:$0xff]  }
  0x17   : > { %v599_v21 = vor.u32 %v597_v18, %v595_v14  ;;  %v611_v29 = vrot.slane %v609_v27, 1  ;;  %v619_v39 = vrot.slane %v617_v35, 1  ;;  %v1228_v40 = vld [vmem:[%s1319_s23 + $0x20] ss:$0 sps:$4 sm:$0xff]   ;;  %v407_v41 = vshrl.u32 %v1229_v32, 16  ;;  %v1233_v57 = vld [vmem:[%s1319_s23 + $0x18] sm:$0xff]  }
  0x18   : > { %v590_v13 = vrot.slane %v588_v10, 1  ;;  %v607_v28 = vor.u32 %v605_v26, %v603_v22  ;;  %v411_v42 = vrot.slane %v409_v37, 1  ;;  %v414_v43 = vshll.u32 %v1230_v36, 16  ;;  %v726_v49 = vld [vmem:[%s1319_s23 + $0x4] sm:$0xe] }
  0x19   : > { %v604_v25 = vsel %vm405_vm2, %v599_v21, %v603_v22  ;;  %v615_v38 = vor.u32 %v613_v34, %v611_v29  ;;  %v621_v45 = vshrl.u32 %v1367_v30, 16  ;;  %v418_v52 = vshrl.u32 %v1230_v36, 16  ;;  %v1234_v3 = vld [vmem:[%s1319_s23 + $0x20] sm:$0x1f]  }
  0x1a   : > { %v591_v17 = vor.u32 %v590_v13, %v586_v9  ;;  %v612_v33 = vsel %vm405_vm2, %v607_v28, %v611_v29  ;;  %v412_v46 = vor.u32 %v411_v42, %v407_v41  ;;  %v416_v47 = vrot.slane %v414_v43, 1  ;;  %v968_v22 = vld [vmem:[%s1465_s2] ss:$0 sm:$0xff] }
  0x1b   : > { %1048 = vmatmul.mubr.msk.bf16.gmra.mrb[4].mxu1 %vm270_vm1, %v1222_v15  ;;  %v620_v44 = vsel %vm405_vm2, %v615_v38, %v619_v39  ;;  %v623_v50 = vor.u32 %v621_v45, %v619_v39  ;;  %v422_v53 = vshll.u32 %v1232_v48, 16  ;;  %v1008_v54 = vcombine.low %v726_v49, %v1327_v6 }
  0x1c   : > { %v596_v20 = vsel %vm405_vm2, %v591_v17, %v595_v14  ;;  %1051 = vmatprep.mubr.msk.bf16.mxu1 %vm1260_vm0, %v1259_v1  ;;  %v417_v51 = vsel %vm405_vm2, %v412_v46, %v416_v47  ;;  %v420_v55 = vor.u32 %v418_v52, %v416_v47  ;;  %v735_v59 = vrot.slane %v1332_v8, 1 }
  0x1d   : > { %1088 = vmatmul.mubr.msk.bf16.vlgmr.msra.gmra.mrb[0].mxu0 %vm270_vm1, %v596_v20  ;;  %v424_v56 = vrot.slane %v422_v53, 1  ;;  %v734_v58 = vrot.slane %v1008_v54, 1  ;;  %v426_v61 = vshrl.u32 %v1232_v48, 16  ;;  %v430_v62 = vshll.u32 %v1233_v57, 16 }
  0x1e   : > { %1108 = vmatpush3.bf16.msra.mxu0 %v1221_v16  ;;  %1091 = vmatprep.mubr.msk.bf16.mxu0 %vm1260_vm0, %v1259_v1  ;;  %v737_v4 = vrot.slane %v1338_v12, 1  ;;  %v434_v6 = vshrl.u32 %v1233_v57, 16  ;;  %v438_v7 = vshll.u32 %v1234_v3, 16  ;;  %v739_v11 = vrot.slane %v1354_v23, 1 }
  0x1f   : > { %v425_v60 = vsel %vm405_vm2, %v420_v55, %v424_v56  ;;  %v736_v63 = vsel %vm733_vm3, %v734_v58, %v735_v59  ;;  %v428_v0 = vor.u32 %v426_v61, %v424_v56  ;;  %v432_v2 = vrot.slane %v430_v62, 1 }
  0x20   : > { %v738_v8 = vsel %vm733_vm3, %v735_v59, %v737_v4  ;;  %v440_v10 = vrot.slane %v438_v7, 1  ;;  %v740_v13 = vsel %vm733_vm3, %v737_v4, %v739_v11  ;;  %v442_v14 = vshrl.u32 %v1234_v3, 16 }
  0x21   : > { %v433_v5 = vsel %vm405_vm2, %v428_v0, %v432_v2  ;;  %v436_v9 = vor.u32 %v434_v6, %v432_v2  ;;  %v741_v15 = vrot.slane %v1367_v30, 1 }
  0x22   : > { %v444_v16 = vor.u32 %v442_v14, %v440_v10 }
  0x23   : > { %1052 = vmatmul.mubr.msk.bf16.gmra.mrb[8].mxu1 %vm270_vm1, %v1224_v24  ;;  %v441_v12 = vsel %vm405_vm2, %v436_v9, %v440_v10  ;;  %v742_v17 = vsel %vm733_vm3, %v739_v11, %v741_v15 }
  0x24   : > { %1055 = vmatprep.mubr.msk.bf16.mxu1 %vm1260_vm0, %v1259_v1 }
  0x25   : > { %1092 = vmatmul.mubr.msk.bf16.gmra.mrb[4].mxu0 %vm270_vm1, %v604_v25 }
  0x26   : > { %1095 = vmatprep.mubr.msk.bf16.mxu0 %vm1260_vm0, %v1259_v1 }
  0x2b   : > { %1056 = vmatmul.mubr.msk.bf16.gmra.mrb[12].mxu1 %vm270_vm1, %v1226_v31 }
  0x2c   : > { %1059 = vmatprep.mubr.msk.bf16.mxu1 %vm1260_vm0, %v1259_v1 }
  0x2d   : > { %1096 = vmatmul.mubr.msk.bf16.gmra.mrb[8].mxu0 %vm270_vm1, %v612_v33 }
  0x2e   : > { %1099 = vmatprep.mubr.msk.bf16.mxu0 %vm1260_vm0, %v1259_v1 }
  0x33   : > { %1060 = vmatmul.mubr.msk.bf16.gmra.mrb[16].mxu1 %vm270_vm1, %v1228_v40 }
  0x34   : > { %1065 = vmatprep.mubr.msk.bf16.mxu1 %vm1260_vm0, %v1259_v1 }
  0x35   : > { %1100 = vmatmul.mubr.msk.bf16.gmra.mrb[12].mxu0 %vm270_vm1, %v620_v44 }
  0x36   : > { %1103 = vmatprep.mubr.msk.bf16.mxu0 %vm1260_vm0, %v1259_v1 }
  0x3b   : > { %1066 = vmatmul.mubr.msk.bf16.vlgmr.msra.gmra.mrb[0].mxu1 %vm270_vm1, %v417_v51 }
  0x3c   : > { %1069 = vmatprep.mubr.msk.bf16.mxu1 %vm1260_vm0, %v1259_v1 }
  0x3d   : > { %1104 = vmatmul.mubr.msk.bf16.gmra.mrb[16].mxu0 %vm270_vm1, %v623_v50 }
  0x3e   : > { %1109 = vmatprep.mubr.msk.bf16.mxu0 %vm1260_vm0, %v1259_v1 }
  0x43   : > { %1070 = vmatmul.mubr.msk.bf16.gmra.mrb[4].mxu1 %vm270_vm1, %v425_v60 }
  0x44   : > { %1073 = vmatprep.mubr.msk.bf16.mxu1 %vm1260_vm0, %v1259_v1 }
  0x45   : > { %1110 = vmatmul.mubr.msk.bf16.vlgmr.msra.gmra.mrb[0].mxu0 %vm270_vm1, %v736_v63 }
  0x46   : > { %1113 = vmatprep.mubr.msk.bf16.mxu0 %vm1260_vm0, %v1259_v1 }
  0x4b   : > { %1074 = vmatmul.mubr.msk.bf16.gmra.mrb[8].mxu1 %vm270_vm1, %v433_v5 }
  0x4c   : > { %1077 = vmatprep.mubr.msk.bf16.mxu1 %vm1260_vm0, %v1259_v1 }
  0x4d   : > { %1114 = vmatmul.mubr.msk.bf16.gmra.mrb[4].mxu0 %vm270_vm1, %v738_v8 }
  0x4e   : > { %1117 = vmatprep.mubr.msk.bf16.mxu0 %vm1260_vm0, %v1259_v1 }
  0x53   : > { %1078 = vmatmul.mubr.msk.bf16.gmra.mrb[12].mxu1 %vm270_vm1, %v441_v12 }
  0x54   : > { %1081 = vmatprep.mubr.msk.bf16.mxu1 %vm1260_vm0, %v1259_v1 }
  0x55   : > { %1118 = vmatmul.mubr.msk.bf16.gmra.mrb[8].mxu0 %vm270_vm1, %v740_v13 }
  0x56   : > { %1121 = vmatprep.mubr.msk.bf16.mxu0 %vm1260_vm0, %v1259_v1 }
  0x5b   : > { %1082 = vmatmul.mubr.msk.bf16.gmra.mrb[16].mxu1 %vm270_vm1, %v444_v16 }
  0x5d   : > { %1122 = vmatmul.mubr.msk.bf16.gmra.mrb[12].mxu0 %vm270_vm1, %v742_v17 }
  0x5e   : > { %1125 = vmatprep.mubr.msk.bf16.mxu0 %vm1260_vm0, %v1259_v1 }
  0x65   : > { %1126 = vmatmul.mubr.msk.bf16.gmra.mrb[16].mxu0 %vm270_vm1, %v741_v15 }
 0x10e   : > { %v500_v18 = vpop.f32.mrb[0].mxu1 }
 0x10f   : > { %v1067_v19 = vpop.f32.mrb[1].mxu1  ;;  %v1129_v23 = vadd.f32 %v968_v22, %v500_v18 }
 0x110   : > { %v503_v20 = vpop.f32.mrb[2].mxu1 }
 0x111   : > { %v1068_v21 = vpop.f32.mrb[3].mxu1  ;;  %v1131_v26 = vadd.f32 %v968_v22, %v503_v20 }
 0x116   : > { %v508_v24 = vpop.f32.mrb[4].mxu1 }
 0x117   : > { %v1071_v25 = vpop.f32.mrb[5].mxu1  ;;  %v1133_v34 = vadd.f32 %v968_v22, %v508_v24 }
 0x118   : > { %v798_v1 = vpop.f32.mrb[0].mxu0  ;;  %v511_v29 = vpop.f32.mrb[6].mxu1 }
 0x119   : > { %v1130_v27 = vadd.f32 %v1129_v23, %v798_v1  ;;  %v1111_v28 = vpop.f32.mrb[1].mxu0  ;;  %v1072_v31 = vpop.f32.mrb[7].mxu1  ;;  %v1135_v38 = vadd.f32 %v968_v22, %v511_v29 }
 0x11a   : > { %v801_v30 = vpop.f32.mrb[2].mxu0 }
 0x11b   : > { %845 = vst [vmem:[%s1443_s6] sm:$0xff] %v1130_v27  ;;  %v1132_v32 = vadd.f32 %v1131_v26, %v801_v30  ;;  %v1112_v33 = vpop.f32.mrb[3].mxu0 }
 0x11d   : > { %846 = vst [vmem:[%s1443_s6 + $0x8] sm:$0xff] %v1132_v32 }
 0x11e   : > { %v516_v35 = vpop.f32.mrb[8].mxu1 }
 0x11f   : > { %v1075_v37 = vpop.f32.mrb[9].mxu1  ;;  %v1137_v46 = vadd.f32 %v968_v22, %v516_v35 }
 0x120   : > { %v806_v36 = vpop.f32.mrb[4].mxu0  ;;  %v519_v41 = vpop.f32.mrb[10].mxu1 }
 0x121   : > { %v1134_v39 = vadd.f32 %v1133_v34, %v806_v36  ;;  %v1115_v40 = vpop.f32.mrb[5].mxu0  ;;  %v1076_v43 = vpop.f32.mrb[11].mxu1  ;;  %v1139_v50 = vadd.f32 %v968_v22, %v519_v41 }
 0x122   : > { %v809_v42 = vpop.f32.mrb[6].mxu0 }
 0x123   : > { %847 = vst [vmem:[%s1443_s6 + $0x10] sm:$0xff] %v1134_v39  ;;  %v1136_v44 = vadd.f32 %v1135_v38, %v809_v42  ;;  %v1116_v45 = vpop.f32.mrb[7].mxu0 }
 0x125   : > { %848 = vst [vmem:[%s1443_s6 + $0x18] sm:$0xff] %v1136_v44 }
 0x126   : > { %v524_v47 = vpop.f32.mrb[12].mxu1 }
 0x127   : > { %v1079_v49 = vpop.f32.mrb[13].mxu1  ;;  %v1141_v58 = vadd.f32 %v968_v22, %v524_v47 }
 0x128   : > { %v814_v48 = vpop.f32.mrb[8].mxu0  ;;  %v527_v53 = vpop.f32.mrb[14].mxu1 }
 0x129   : > { %v1138_v51 = vadd.f32 %v1137_v46, %v814_v48  ;;  %v1119_v52 = vpop.f32.mrb[9].mxu0  ;;  %v1080_v55 = vpop.f32.mrb[15].mxu1  ;;  %v1143_v62 = vadd.f32 %v968_v22, %v527_v53 }
 0x12a   : > { %v817_v54 = vpop.f32.mrb[10].mxu0 }
 0x12b   : > { %849 = vst [vmem:[%s1443_s6 + $0x20] sm:$0xff] %v1138_v51  ;;  %v1140_v56 = vadd.f32 %v1139_v50, %v817_v54  ;;  %v1120_v57 = vpop.f32.mrb[11].mxu0 }
 0x12d   : > { %850 = vst [vmem:[%s1443_s6 + $0x28] sm:$0xff] %v1140_v56 }
 0x12e   : > { %v532_v59 = vpop.f32.mrb[16].mxu1 }
 0x12f   : > { %v1083_v61 = vpop.f32.mrb[17].mxu1  ;;  %v1145_v7 = vadd.f32 %v968_v22, %v532_v59 }
 0x130   : > { %v822_v60 = vpop.f32.mrb[12].mxu0  ;;  %v535_v2 = vpop.f32.mrb[18].mxu1 }
 0x131   : > { %v1142_v63 = vadd.f32 %v1141_v58, %v822_v60  ;;  %v1123_v0 = vpop.f32.mrb[13].mxu0  ;;  %v1084_v4 = vpop.f32.mrb[19].mxu1 }
 0x132   : > { %v825_v3 = vpop.f32.mrb[14].mxu0 }
 0x133   : > { %851 = vst [vmem:[%s1443_s6 + $0x30] sm:$0xff] %v1142_v63  ;;  %v1144_v5 = vadd.f32 %v1143_v62, %v825_v3  ;;  %v1124_v6 = vpop.f32.mrb[15].mxu0 }
 0x135   : > { %852 = vst [vmem:[%s1443_s6 + $0x38] sm:$0xff] %v1144_v5 }
 0x138   : > { %v830_v8 = vpop.f32.mrb[16].mxu0 }
 0x139   : > { %v1146_v9 = vadd.f32 %v1145_v7, %v830_v8  ;;  %v1127_v10 = vpop.f32.mrb[17].mxu0 }
 0x13a   : > { %v833_v11 = vpop.f32.mrb[18].mxu0 }
 0x13b   : > { %853 = vst [vmem:[%s1443_s6 + $0x40] sm:$0xff] %v1146_v9  ;;  %v1128_v12 = vpop.f32.mrb[19].mxu0 }
 0x13c PF: > { %s13_s14 = sadd.s32 1, %s1257_s14   ;;  %s1467_s12 = smov %s1253_s13 }
 0x13d   : > { %p10_p5 = scmp.ge.s32.totalorder %s13_s14, 4   ;;  %s1468_s13 = smov %s1470_s15 }
 0x13f   :  { %12 = sbr.rel (!%p10_p5) target bundleno = 2 (0x2), region = 71 }

</bundles_post_ra>
